<compile_context>
chip_gen: v5e
topology: v5e:2x2
jax: 0.10.0
libtpu: 0.0.40
codegen_flags: <defaults>
</compile_context>

<pallas_src>
import functools

import jax
import jax.numpy as jnp
from jax import lax
from jax.experimental import pallas as pl
from jax.experimental.pallas import tpu as pltpu


def _round_up(x, m):
    return (x + m - 1) // m * m


def _ln_normalize(chunk_f32, eps, inv_c, out_dtype):
    """Row-wise LayerNorm over the last axis; single read (E[x^2]-mu^2 form)."""
    s1 = jnp.sum(chunk_f32, axis=-1, keepdims=True)
    s2 = jnp.sum(chunk_f32 * chunk_f32, axis=-1, keepdims=True)
    mu = s1 * inv_c
    var = jnp.maximum(s2 * inv_c - mu * mu, 0.0)
    r = lax.rsqrt(var + eps)
    return ((chunk_f32 - mu) * r).astype(out_dtype)


def _downsample_kernel_fused(patches_ref, wmat_ref, cbias_ref, out_ref, *, eps, cin):
    # patches_ref: (1, TP, 4*C)  wmat_ref: (4*C, Coutp)  cbias_ref: (1, Coutp)
    # out_ref:     (1, TP, Coutp)
    mm_dtype = wmat_ref.dtype
    inv_c = 1.0 / cin
    xall = patches_ref[0]                                    # (TP, 4C) in MXU dtype
    parts = []
    for j in range(4):                                       # static unroll; 128-aligned lane slices
        chunk = xall[:, j * cin:(j + 1) * cin].astype(jnp.float32)
        parts.append(_ln_normalize(chunk, eps, inv_c, mm_dtype))
    xn = jnp.concatenate(parts, axis=-1)                     # (TP, 4C)
    acc = jnp.dot(xn, wmat_ref[...], preferred_element_type=jnp.float32)
    acc = acc + cbias_ref[...].astype(jnp.float32)           # (1, Coutp) broadcast
    out_ref[0] = acc.astype(out_ref.dtype)


def _downsample_kernel_chunked(patches_ref, wmat_ref, cbias_ref, out_ref, *, eps, cin):
    # patches_ref: (1, 4, TP, C)  wmat_ref: (4, C, Coutp)  cbias_ref: (1, Coutp)
    # out_ref:     (1, TP, Coutp)
    tp, coutp = out_ref.shape[1], out_ref.shape[2]
    mm_dtype = wmat_ref.dtype
    inv_c = 1.0 / cin
    acc = jnp.zeros((tp, coutp), jnp.float32)
    for j in range(4):                                       # static unroll over kh*2+kw
        chunk = patches_ref[0, j].astype(jnp.float32)        # (TP, C) leading-axis index
        xn = _ln_normalize(chunk, eps, inv_c, mm_dtype)
        acc = acc + jnp.dot(xn, wmat_ref[j], preferred_element_type=jnp.float32)
    acc = acc + cbias_ref[...].astype(jnp.float32)
    out_ref[0] = acc.astype(out_ref.dtype)


def spatial_downsample(x, ln_gamma, ln_beta, conv_w, conv_b, *, eps=1e-6,
                       matmul_dtype=jnp.bfloat16, tile_p=256):
    """x: (B, Cin, H, W) NCHW. conv_w: (Cout, Cin, 2, 2). Returns (B, Cout, H/2, W/2)."""
    B, C, H, W = x.shape
    Cout = conv_w.shape[0]
    assert H % 2 == 0 and W % 2 == 0
    Hh, Wh = H // 2, W // 2
    P = Hh * Wh
    fused = (C % 128 == 0)            # 128-aligned lane slices -> single K=4C matmul

    mm_itemsize = jnp.dtype(matmul_dtype).itemsize
    out_itemsize = jnp.dtype(x.dtype).itemsize

    # --- fold LayerNorm affine into the conv weight / bias.
    # (Cout, Cin, kh, kw) -> (kh, kw, Cin, Cout) -> (4, Cin, Cout), chunk j = kh*2+kw
    wmat = jnp.transpose(conv_w, (2, 3, 1, 0)).reshape(4, C, Cout).astype(jnp.float32)
    wmat_f = wmat * ln_gamma.astype(jnp.float32)[None, :, None]
    bias_f = conv_b.astype(jnp.float32) + jnp.einsum(
        "c,jco->o", ln_beta.astype(jnp.float32), wmat)

    Coutp = _round_up(Cout, 128)      # lane-dense output stores

    # --- generation-aware VMEM budget (v7x has only 64 MiB physical VMEM).
    try:
        vmem_phys = int(pltpu.get_tpu_info().vmem_capacity_bytes)
    except Exception:
        vmem_phys = 64 * 1024 * 1024
    vmem_cap = min(100 * 1024 * 1024, (vmem_phys * 3) // 4)

    # --- pick TP: >= 8 grid steps (pipeline depth + 2 TensorCores), capped by
    #     tile_p, then shrunk until the per-step working set fits the budget.
    TP = max(8, min(tile_p, _round_up(pl.cdiv(P, 8), 8)))

    def _step_bytes(tp):
        in_b = 4 * tp * C * mm_itemsize                     # patch tile
        out_b = tp * Coutp * out_itemsize                    # output tile
        w_b = 4 * C * Coutp * mm_itemsize + Coutp * 4        # single-buffered invariants
        f32_tmp = 2 * 4 * tp * C * 4 + tp * Coutp * 4        # upcast + xn + acc
        return 2 * in_b + 2 * out_b + w_b + f32_tmp

    while TP > 8 and _step_bytes(TP) > vmem_cap:
        TP = max(8, _round_up(TP // 2, 8))
    Pp = _round_up(P, TP)
    vmem_limit = int(max(32 * 1024 * 1024, min(_step_bytes(TP) * 2, vmem_cap)))

    # --- glue: NCHW -> patch tensor, already in MXU dtype.  chunk j = kh*2+kw.
    xp = x.reshape(B, C, Hh, 2, Wh, 2)
    if fused:
        # (B, Hh, Wh, kh, kw, C) -> (B, P, 4*C): chunk-major within the lane dim.
        xp = jnp.transpose(xp, (0, 2, 4, 3, 5, 1)).reshape(B, P, 4 * C)
        if Pp != P:
            xp = jnp.pad(xp, ((0, 0), (0, Pp - P), (0, 0)))
        wmat_k = jnp.pad(wmat_f.reshape(4 * C, Cout),
                         ((0, 0), (0, Coutp - Cout))).astype(matmul_dtype)
        kernel = functools.partial(_downsample_kernel_fused, eps=eps, cin=C)
    else:
        # (B, kh, kw, Hh, Wh, C) -> (B, 4, P, C): chunk on a leading axis.
        xp = jnp.transpose(xp, (0, 3, 5, 2, 4, 1)).reshape(B, 4, P, C)
        if Pp != P:
            xp = jnp.pad(xp, ((0, 0), (0, 0), (0, Pp - P), (0, 0)))
        wmat_k = jnp.pad(wmat_f, ((0, 0), (0, 0), (0, Coutp - Cout))).astype(matmul_dtype)
        kernel = functools.partial(_downsample_kernel_chunked, eps=eps, cin=C)
    xp = xp.astype(matmul_dtype)
    cbias_k = jnp.pad(bias_f, (0, Coutp - Cout))[None, :].astype(jnp.float32)

    grid = (B, Pp // TP)
    cost = pl.CostEstimate(
        flops=int(2 * B * Pp * 4 * C * Coutp + 8 * B * Pp * 4 * C),
        transcendentals=int(B * Pp * 4),
        bytes_accessed=int(xp.size * xp.dtype.itemsize
                           + wmat_k.size * wmat_k.dtype.itemsize
                           + cbias_k.size * 4
                           + B * Pp * Coutp * out_itemsize))

    def _call(single_buffer_invariants):
        # Grid-invariant weight/bias: single-buffer them (their index_map is
        # constant, so a second pipeline buffer is pure VMEM waste).
        wkw = dict(pipeline_mode=pl.Buffered(1)) if single_buffer_invariants else {}
        if fused:
            in_specs = [
                pl.BlockSpec((1, TP, 4 * C), lambda b, p: (b, p, 0)),
                pl.BlockSpec((4 * C, Coutp), lambda b, p: (0, 0), **wkw),
                pl.BlockSpec((1, Coutp), lambda b, p: (0, 0), **wkw),
            ]
        else:
            in_specs = [
                pl.BlockSpec((1, 4, TP, C), lambda b, p: (b, 0, p, 0)),
                pl.BlockSpec((4, C, Coutp), lambda b, p: (0, 0, 0), **wkw),
                pl.BlockSpec((1, Coutp), lambda b, p: (0, 0), **wkw),
            ]
        return pl.pallas_call(
            kernel,
            out_shape=jax.ShapeDtypeStruct((B, Pp, Coutp), x.dtype),
            grid_spec=pltpu.PrefetchScalarGridSpec(
                num_scalar_prefetch=0,
                grid=grid,
                in_specs=in_specs,
                out_specs=pl.BlockSpec((1, TP, Coutp), lambda b, p: (b, p, 0))),
            compiler_params=pltpu.CompilerParams(
                dimension_semantics=("parallel", "parallel"),
                vmem_limit_bytes=vmem_limit),
            cost_estimate=cost,
        )(xp, wmat_k, cbias_k)

    try:
        out_patches = _call(True)
    except Exception:
        # Fallback for Pallas versions without BlockSpec(pipeline_mode=...).
        out_patches = _call(False)

    # --- glue: (B, Pp, Coutp) -> (B, Cout, H/2, W/2)
    out = out_patches[:, :P, :Cout].reshape(B, Hh, Wh, Cout)
    return jnp.transpose(out, (0, 3, 1, 2))


def _reference(x, ln_gamma, ln_beta, conv_w, conv_b, *, eps=1e-6):
    """Plain-JAX reference matching the PyTorch module."""
    mu = jnp.mean(x, axis=1, keepdims=True)
    var = jnp.mean((x - mu) ** 2, axis=1, keepdims=True)
    xn = (x - mu) / jnp.sqrt(var + eps)
    xn = ln_gamma[None, :, None, None] * xn + ln_beta[None, :, None, None]
    y = lax.conv_general_dilated(
        xn, conv_w, window_strides=(2, 2), padding="VALID",
        dimension_numbers=("NCHW", "OIHW", "NCHW"))
    return y + conv_b[None, :, None, None]


def _make_inputs(key, B, Cin, H, W, Cout):
    kx, kw, kb, kg, kbeta = jax.random.split(key, 5)
    x = jax.random.normal(kx, (B, Cin, H, W), dtype=jnp.float32)
    conv_w = 0.1 * jax.random.normal(kw, (Cout, Cin, 2, 2), dtype=jnp.float32)
    conv_b = 0.1 * jax.random.normal(kb, (Cout,), dtype=jnp.float32)
    ln_gamma = (jnp.ones((Cin,), jnp.float32)
                + 0.05 * jax.random.normal(kg, (Cin,), dtype=jnp.float32))
    ln_beta = 0.05 * jax.random.normal(kbeta, (Cin,), dtype=jnp.float32)
    return x, ln_gamma, ln_beta, conv_w, conv_b


if __name__ == "__main__":
    eps = 1e-6
    key = jax.random.PRNGKey(0)
    k1, k2 = jax.random.split(key)

    # ---- test 1: demo shape (Cin not a multiple of 128 -> chunked path).
    B, Cin, H, W, Cout = 2, 4, 16, 16, 8
    args1 = _make_inputs(k1, B, Cin, H, W, Cout)
    ref1 = _reference(*args1, eps=eps)
    # Reference on the bf16-quantized activation (the bf16 path quantizes the
    # patch stream to bf16 by design before the in-kernel LayerNorm).
    ref1_q = _reference(args1[0].astype(jnp.bfloat16).astype(jnp.float32),
                        *args1[1:], eps=eps)

    out1_f32 = jax.block_until_ready(
        spatial_downsample(*args1, eps=eps, matmul_dtype=jnp.float32))
    assert out1_f32.shape == (B, Cout, H // 2, W // 2), out1_f32.shape
    assert jnp.allclose(out1_f32, ref1, atol=5e-4, rtol=5e-4), \
        float(jnp.max(jnp.abs(out1_f32 - ref1)))

    out1_bf16 = jax.block_until_ready(spatial_downsample(*args1, eps=eps))
    assert out1_bf16.shape == (B, Cout, H // 2, W // 2), out1_bf16.shape
    assert jnp.allclose(out1_bf16, ref1_q, atol=2e-2, rtol=2e-2), \
        float(jnp.max(jnp.abs(out1_bf16 - ref1_q)))

    # ---- test 2: Cin multiple of 128 -> fused single K = 4*Cin matmul path.
    B2, Cin2, H2, W2, Cout2 = 1, 128, 8, 8, 32
    args2 = _make_inputs(k2, B2, Cin2, H2, W2, Cout2)
    ref2 = _reference(*args2, eps=eps)
    ref2_q = _reference(args2[0].astype(jnp.bfloat16).astype(jnp.float32),
                        *args2[1:], eps=eps)

    out2_f32 = jax.block_until_ready(
        spatial_downsample(*args2, eps=eps, matmul_dtype=jnp.float32))
    assert out2_f32.shape == (B2, Cout2, H2 // 2, W2 // 2), out2_f32.shape
    assert jnp.allclose(out2_f32, ref2, atol=1e-3, rtol=1e-3), \
        float(jnp.max(jnp.abs(out2_f32 - ref2)))

    out2_bf16 = jax.block_until_ready(spatial_downsample(*args2, eps=eps))
    assert out2_bf16.shape == (B2, Cout2, H2 // 2, W2 // 2), out2_bf16.shape
    assert jnp.allclose(out2_bf16, ref2_q, atol=4e-2, rtol=2e-2), \
        float(jnp.max(jnp.abs(out2_bf16 - ref2_q)))

    print("KERNEL_OK")
</pallas_src>

<mosaic_0001>
module attributes {stable_mosaic.version = 11 : i64} {
  func.func @_downsample_kernel_chunked(%arg0: i32, %arg1: i32, %arg2: memref<1x4x8x4xf32, #tpu.memory_space<vmem>>, %arg3: memref<4x4x128xf32, #tpu.memory_space<vmem>>, %arg4: memref<1x128xf32, #tpu.memory_space<vmem>>, %arg5: memref<1x8x128xf32, #tpu.memory_space<vmem>>) attributes {dimension_semantics = [#tpu.dimension_semantics<parallel>, #tpu.dimension_semantics<parallel>], iteration_bounds = array<i64: 2, 8>, scalar_prefetch = 0 : i64, scratch_operands = 0 : i64, tpu.core_type = #tpu.core_type<tc>, window_params = [{transform_indices = @transform_0, window_bounds = array<i64: 1, 4, 8, 4>}, {pipeline_mode = #tpu.pipeline_mode<synchronous>, transform_indices = @transform_1, window_bounds = array<i64: 4, 4, 128>}, {pipeline_mode = #tpu.pipeline_mode<synchronous>, transform_indices = @transform_2, window_bounds = array<i64: 1, 128>}, {transform_indices = @transform_3, window_bounds = array<i64: 1, 8, 128>}]} {
    %cst = arith.constant 0.000000e+00 : f32
    %0 = vector.broadcast %cst : f32 to vector<8x128xf32>
    %c0 = arith.constant 0 : index
    %c0_0 = arith.constant 0 : index
    %c0_1 = arith.constant 0 : index
    %c0_2 = arith.constant 0 : index
    %1 = vector.load %arg2[%c0, %c0_0, %c0_1, %c0_2] : memref<1x4x8x4xf32, #tpu.memory_space<vmem>>, vector<1x1x8x4xf32>
    %2 = vector.shape_cast %1 : vector<1x1x8x4xf32> to vector<8x4xf32>
    %cst_3 = arith.constant dense<0.000000e+00> : vector<8xf32>
    %3 = vector.multi_reduction <add>, %2, %cst_3 [1] : vector<8x4xf32> to vector<8xf32>
    %4 = vector.shape_cast %3 : vector<8xf32> to vector<8x1xf32>
    %5 = arith.mulf %2, %2 : vector<8x4xf32>
    %cst_4 = arith.constant dense<0.000000e+00> : vector<8xf32>
    %6 = vector.multi_reduction <add>, %5, %cst_4 [1] : vector<8x4xf32> to vector<8xf32>
    %7 = vector.shape_cast %6 : vector<8xf32> to vector<8x1xf32>
    %cst_5 = arith.constant 2.500000e-01 : f32
    %8 = vector.broadcast %cst_5 : f32 to vector<8x1xf32>
    %9 = arith.mulf %4, %8 : vector<8x1xf32>
    %cst_6 = arith.constant 2.500000e-01 : f32
    %10 = vector.broadcast %cst_6 : f32 to vector<8x1xf32>
    %11 = arith.mulf %7, %10 : vector<8x1xf32>
    %12 = arith.mulf %9, %9 : vector<8x1xf32>
    %13 = arith.subf %11, %12 : vector<8x1xf32>
    %cst_7 = arith.constant 0.000000e+00 : f32
    %14 = vector.broadcast %cst_7 : f32 to vector<8x1xf32>
    %15 = arith.maximumf %13, %14 : vector<8x1xf32>
    %cst_8 = arith.constant 9.99999997E-7 : f32
    %16 = vector.broadcast %cst_8 : f32 to vector<8x1xf32>
    %17 = arith.addf %15, %16 : vector<8x1xf32>
    %18 = math.rsqrt %17 : vector<8x1xf32>
    %19 = vector.broadcast %9 : vector<8x1xf32> to vector<8x4xf32>
    %20 = arith.subf %2, %19 : vector<8x4xf32>
    %21 = vector.broadcast %18 : vector<8x1xf32> to vector<8x4xf32>
    %22 = arith.mulf %20, %21 : vector<8x4xf32>
    %c0_9 = arith.constant 0 : index
    %c0_10 = arith.constant 0 : index
    %c0_11 = arith.constant 0 : index
    %23 = vector.load %arg3[%c0_9, %c0_10, %c0_11] : memref<4x4x128xf32, #tpu.memory_space<vmem>>, vector<1x4x128xf32>
    %24 = vector.shape_cast %23 : vector<1x4x128xf32> to vector<4x128xf32>
    %cst_12 = arith.constant dense<0.000000e+00> : vector<8x128xf32>
    %25 = tpu.matmul %22, %24, %cst_12 {dimension_numbers = #tpu.dot_dimension_numbers<[1], [0], [0], [1], [0, 0, 1, 1], [], []>} : vector<8x4xf32>, vector<4x128xf32>, vector<8x128xf32> -> vector<8x128xf32>
    %26 = arith.addf %0, %25 : vector<8x128xf32>
    %c0_13 = arith.constant 0 : index
    %c1 = arith.constant 1 : index
    %c0_14 = arith.constant 0 : index
    %c0_15 = arith.constant 0 : index
    %27 = vector.load %arg2[%c0_13, %c1, %c0_14, %c0_15] : memref<1x4x8x4xf32, #tpu.memory_space<vmem>>, vector<1x1x8x4xf32>
    %28 = vector.shape_cast %27 : vector<1x1x8x4xf32> to vector<8x4xf32>
    %cst_16 = arith.constant dense<0.000000e+00> : vector<8xf32>
    %29 = vector.multi_reduction <add>, %28, %cst_16 [1] : vector<8x4xf32> to vector<8xf32>
    %30 = vector.shape_cast %29 : vector<8xf32> to vector<8x1xf32>
    %31 = arith.mulf %28, %28 : vector<8x4xf32>
    %cst_17 = arith.constant dense<0.000000e+00> : vector<8xf32>
    %32 = vector.multi_reduction <add>, %31, %cst_17 [1] : vector<8x4xf32> to vector<8xf32>
    %33 = vector.shape_cast %32 : vector<8xf32> to vector<8x1xf32>
    %cst_18 = arith.constant 2.500000e-01 : f32
    %34 = vector.broadcast %cst_18 : f32 to vector<8x1xf32>
    %35 = arith.mulf %30, %34 : vector<8x1xf32>
    %cst_19 = arith.constant 2.500000e-01 : f32
    %36 = vector.broadcast %cst_19 : f32 to vector<8x1xf32>
    %37 = arith.mulf %33, %36 : vector<8x1xf32>
    %38 = arith.mulf %35, %35 : vector<8x1xf32>
    %39 = arith.subf %37, %38 : vector<8x1xf32>
    %cst_20 = arith.constant 0.000000e+00 : f32
    %40 = vector.broadcast %cst_20 : f32 to vector<8x1xf32>
    %41 = arith.maximumf %39, %40 : vector<8x1xf32>
    %cst_21 = arith.constant 9.99999997E-7 : f32
    %42 = vector.broadcast %cst_21 : f32 to vector<8x1xf32>
    %43 = arith.addf %41, %42 : vector<8x1xf32>
    %44 = math.rsqrt %43 : vector<8x1xf32>
    %45 = vector.broadcast %35 : vector<8x1xf32> to vector<8x4xf32>
    %46 = arith.subf %28, %45 : vector<8x4xf32>
    %47 = vector.broadcast %44 : vector<8x1xf32> to vector<8x4xf32>
    %48 = arith.mulf %46, %47 : vector<8x4xf32>
    %c1_22 = arith.constant 1 : index
    %c0_23 = arith.constant 0 : index
    %c0_24 = arith.constant 0 : index
    %49 = vector.load %arg3[%c1_22, %c0_23, %c0_24] : memref<4x4x128xf32, #tpu.memory_space<vmem>>, vector<1x4x128xf32>
    %50 = vector.shape_cast %49 : vector<1x4x128xf32> to vector<4x128xf32>
    %cst_25 = arith.constant dense<0.000000e+00> : vector<8x128xf32>
    %51 = tpu.matmul %48, %50, %cst_25 {dimension_numbers = #tpu.dot_dimension_numbers<[1], [0], [0], [1], [0, 0, 1, 1], [], []>} : vector<8x4xf32>, vector<4x128xf32>, vector<8x128xf32> -> vector<8x128xf32>
    %52 = arith.addf %26, %51 : vector<8x128xf32>
    %c0_26 = arith.constant 0 : index
    %c2 = arith.constant 2 : index
    %c0_27 = arith.constant 0 : index
    %c0_28 = arith.constant 0 : index
    %53 = vector.load %arg2[%c0_26, %c2, %c0_27, %c0_28] : memref<1x4x8x4xf32, #tpu.memory_space<vmem>>, vector<1x1x8x4xf32>
    %54 = vector.shape_cast %53 : vector<1x1x8x4xf32> to vector<8x4xf32>
    %cst_29 = arith.constant dense<0.000000e+00> : vector<8xf32>
    %55 = vector.multi_reduction <add>, %54, %cst_29 [1] : vector<8x4xf32> to vector<8xf32>
    %56 = vector.shape_cast %55 : vector<8xf32> to vector<8x1xf32>
    %57 = arith.mulf %54, %54 : vector<8x4xf32>
    %cst_30 = arith.constant dense<0.000000e+00> : vector<8xf32>
    %58 = vector.multi_reduction <add>, %57, %cst_30 [1] : vector<8x4xf32> to vector<8xf32>
    %59 = vector.shape_cast %58 : vector<8xf32> to vector<8x1xf32>
    %cst_31 = arith.constant 2.500000e-01 : f32
    %60 = vector.broadcast %cst_31 : f32 to vector<8x1xf32>
    %61 = arith.mulf %56, %60 : vector<8x1xf32>
    %cst_32 = arith.constant 2.500000e-01 : f32
    %62 = vector.broadcast %cst_32 : f32 to vector<8x1xf32>
    %63 = arith.mulf %59, %62 : vector<8x1xf32>
    %64 = arith.mulf %61, %61 : vector<8x1xf32>
    %65 = arith.subf %63, %64 : vector<8x1xf32>
    %cst_33 = arith.constant 0.000000e+00 : f32
    %66 = vector.broadcast %cst_33 : f32 to vector<8x1xf32>
    %67 = arith.maximumf %65, %66 : vector<8x1xf32>
    %cst_34 = arith.constant 9.99999997E-7 : f32
    %68 = vector.broadcast %cst_34 : f32 to vector<8x1xf32>
    %69 = arith.addf %67, %68 : vector<8x1xf32>
    %70 = math.rsqrt %69 : vector<8x1xf32>
    %71 = vector.broadcast %61 : vector<8x1xf32> to vector<8x4xf32>
    %72 = arith.subf %54, %71 : vector<8x4xf32>
    %73 = vector.broadcast %70 : vector<8x1xf32> to vector<8x4xf32>
    %74 = arith.mulf %72, %73 : vector<8x4xf32>
    %c2_35 = arith.constant 2 : index
    %c0_36 = arith.constant 0 : index
    %c0_37 = arith.constant 0 : index
    %75 = vector.load %arg3[%c2_35, %c0_36, %c0_37] : memref<4x4x128xf32, #tpu.memory_space<vmem>>, vector<1x4x128xf32>
    %76 = vector.shape_cast %75 : vector<1x4x128xf32> to vector<4x128xf32>
    %cst_38 = arith.constant dense<0.000000e+00> : vector<8x128xf32>
    %77 = tpu.matmul %74, %76, %cst_38 {dimension_numbers = #tpu.dot_dimension_numbers<[1], [0], [0], [1], [0, 0, 1, 1], [], []>} : vector<8x4xf32>, vector<4x128xf32>, vector<8x128xf32> -> vector<8x128xf32>
    %78 = arith.addf %52, %77 : vector<8x128xf32>
    %c0_39 = arith.constant 0 : index
    %c3 = arith.constant 3 : index
    %c0_40 = arith.constant 0 : index
    %c0_41 = arith.constant 0 : index
    %79 = vector.load %arg2[%c0_39, %c3, %c0_40, %c0_41] : memref<1x4x8x4xf32, #tpu.memory_space<vmem>>, vector<1x1x8x4xf32>
    %80 = vector.shape_cast %79 : vector<1x1x8x4xf32> to vector<8x4xf32>
    %cst_42 = arith.constant dense<0.000000e+00> : vector<8xf32>
    %81 = vector.multi_reduction <add>, %80, %cst_42 [1] : vector<8x4xf32> to vector<8xf32>
    %82 = vector.shape_cast %81 : vector<8xf32> to vector<8x1xf32>
    %83 = arith.mulf %80, %80 : vector<8x4xf32>
    %cst_43 = arith.constant dense<0.000000e+00> : vector<8xf32>
    %84 = vector.multi_reduction <add>, %83, %cst_43 [1] : vector<8x4xf32> to vector<8xf32>
    %85 = vector.shape_cast %84 : vector<8xf32> to vector<8x1xf32>
    %cst_44 = arith.constant 2.500000e-01 : f32
    %86 = vector.broadcast %cst_44 : f32 to vector<8x1xf32>
    %87 = arith.mulf %82, %86 : vector<8x1xf32>
    %cst_45 = arith.constant 2.500000e-01 : f32
    %88 = vector.broadcast %cst_45 : f32 to vector<8x1xf32>
    %89 = arith.mulf %85, %88 : vector<8x1xf32>
    %90 = arith.mulf %87, %87 : vector<8x1xf32>
    %91 = arith.subf %89, %90 : vector<8x1xf32>
    %cst_46 = arith.constant 0.000000e+00 : f32
    %92 = vector.broadcast %cst_46 : f32 to vector<8x1xf32>
    %93 = arith.maximumf %91, %92 : vector<8x1xf32>
    %cst_47 = arith.constant 9.99999997E-7 : f32
    %94 = vector.broadcast %cst_47 : f32 to vector<8x1xf32>
    %95 = arith.addf %93, %94 : vector<8x1xf32>
    %96 = math.rsqrt %95 : vector<8x1xf32>
    %97 = vector.broadcast %87 : vector<8x1xf32> to vector<8x4xf32>
    %98 = arith.subf %80, %97 : vector<8x4xf32>
    %99 = vector.broadcast %96 : vector<8x1xf32> to vector<8x4xf32>
    %100 = arith.mulf %98, %99 : vector<8x4xf32>
    %c3_48 = arith.constant 3 : index
    %c0_49 = arith.constant 0 : index
    %c0_50 = arith.constant 0 : index
    %101 = vector.load %arg3[%c3_48, %c0_49, %c0_50] : memref<4x4x128xf32, #tpu.memory_space<vmem>>, vector<1x4x128xf32>
    %102 = vector.shape_cast %101 : vector<1x4x128xf32> to vector<4x128xf32>
    %cst_51 = arith.constant dense<0.000000e+00> : vector<8x128xf32>
    %103 = tpu.matmul %100, %102, %cst_51 {dimension_numbers = #tpu.dot_dimension_numbers<[1], [0], [0], [1], [0, 0, 1, 1], [], []>} : vector<8x4xf32>, vector<4x128xf32>, vector<8x128xf32> -> vector<8x128xf32>
    %104 = arith.addf %78, %103 : vector<8x128xf32>
    %c0_52 = arith.constant 0 : index
    %c0_53 = arith.constant 0 : index
    %105 = vector.load %arg4[%c0_52, %c0_53] : memref<1x128xf32, #tpu.memory_space<vmem>>, vector<1x128xf32>
    %106 = vector.broadcast %105 : vector<1x128xf32> to vector<8x128xf32>
    %107 = arith.addf %104, %106 : vector<8x128xf32>
    %c0_54 = arith.constant 0 : index
    %c0_55 = arith.constant 0 : index
    %c0_56 = arith.constant 0 : index
    %108 = vector.load %arg5[%c0_54, %c0_55, %c0_56] : memref<1x8x128xf32, #tpu.memory_space<vmem>>, vector<1x8x128xf32>
    %109 = vector.shape_cast %108 : vector<1x8x128xf32> to vector<8x128xf32>
    %110 = vector.shape_cast %107 : vector<8x128xf32> to vector<1x8x128xf32>
    tpu.vector_store %arg5[%c0_54, %c0_55, %c0_56], %110 {strides = array<i32>} : memref<1x8x128xf32, #tpu.memory_space<vmem>>, vector<1x8x128xf32>,
    return
  }
  func.func @transform_0(%arg0: i32, %arg1: i32) -> (i32, i32, i32, i32) {
    %c0_i32 = arith.constant 0 : i32
    %c0_i32_0 = arith.constant 0 : i32
    %c0_i32_1 = arith.constant 0 : i32
    return %arg0, %c0_i32, %arg1, %c0_i32_0 : i32, i32, i32, i32
  }
  func.func @transform_1(%arg0: i32, %arg1: i32) -> (i32, i32, i32) {
    %c0_i32 = arith.constant 0 : i32
    %c0_i32_0 = arith.constant 0 : i32
    %c0_i32_1 = arith.constant 0 : i32
    %c0_i32_2 = arith.constant 0 : i32
    return %c0_i32, %c0_i32_0, %c0_i32_1 : i32, i32, i32
  }
  func.func @transform_2(%arg0: i32, %arg1: i32) -> (i32, i32) {
    %c0_i32 = arith.constant 0 : i32
    %c0_i32_0 = arith.constant 0 : i32
    %c0_i32_1 = arith.constant 0 : i32
    return %c0_i32, %c0_i32_0 : i32, i32
  }
  func.func @transform_3(%arg0: i32, %arg1: i32) -> (i32, i32, i32) {
    %c0_i32 = arith.constant 0 : i32
    %c0_i32_0 = arith.constant 0 : i32
    return %arg0, %arg1, %c0_i32 : i32, i32, i32
  }
}

module attributes {stable_mosaic.version = 11 : i64} {
  func.func @_downsample_kernel_chunked(%arg0: i32, %arg1: i32, %arg2: memref<1x4x8x4xf32, #tpu.memory_space<vmem>>, %arg3: memref<4x4x128xf32, #tpu.memory_space<vmem>>, %arg4: memref<1x128xf32, #tpu.memory_space<vmem>>, %arg5: memref<1x8x128xf32, #tpu.memory_space<vmem>>) attributes {dimension_semantics = [#tpu.dimension_semantics<parallel>, #tpu.dimension_semantics<parallel>], iteration_bounds = array<i64: 2, 8>, scalar_prefetch = 0 : i64, scratch_operands = 0 : i64, tpu.core_type = #tpu.core_type<tc>, window_params = [{transform_indices = @transform_0, window_bounds = array<i64: 1, 4, 8, 4>}, {pipeline_mode = #tpu.pipeline_mode<synchronous>, transform_indices = @transform_1, window_bounds = array<i64: 4, 4, 128>}, {pipeline_mode = #tpu.pipeline_mode<synchronous>, transform_indices = @transform_2, window_bounds = array<i64: 1, 128>}, {transform_indices = @transform_3, window_bounds = array<i64: 1, 8, 128>}]} {
    %cst = arith.constant 0.000000e+00 : f32
    %0 = vector.broadcast %cst : f32 to vector<8x128xf32>
    %c0 = arith.constant 0 : index
    %c0_0 = arith.constant 0 : index
    %c0_1 = arith.constant 0 : index
    %c0_2 = arith.constant 0 : index
    %1 = vector.load %arg2[%c0, %c0_0, %c0_1, %c0_2] : memref<1x4x8x4xf32, #tpu.memory_space<vmem>>, vector<1x1x8x4xf32>
    %2 = vector.shape_cast %1 : vector<1x1x8x4xf32> to vector<8x4xf32>
    %cst_3 = arith.constant dense<0.000000e+00> : vector<8xf32>
    %3 = vector.multi_reduction <add>, %2, %cst_3 [1] : vector<8x4xf32> to vector<8xf32>
    %4 = vector.shape_cast %3 : vector<8xf32> to vector<8x1xf32>
    %5 = arith.mulf %2, %2 : vector<8x4xf32>
    %cst_4 = arith.constant dense<0.000000e+00> : vector<8xf32>
    %6 = vector.multi_reduction <add>, %5, %cst_4 [1] : vector<8x4xf32> to vector<8xf32>
    %7 = vector.shape_cast %6 : vector<8xf32> to vector<8x1xf32>
    %cst_5 = arith.constant 2.500000e-01 : f32
    %8 = vector.broadcast %cst_5 : f32 to vector<8x1xf32>
    %9 = arith.mulf %4, %8 : vector<8x1xf32>
    %cst_6 = arith.constant 2.500000e-01 : f32
    %10 = vector.broadcast %cst_6 : f32 to vector<8x1xf32>
    %11 = arith.mulf %7, %10 : vector<8x1xf32>
    %12 = arith.mulf %9, %9 : vector<8x1xf32>
    %13 = arith.subf %11, %12 : vector<8x1xf32>
    %cst_7 = arith.constant 0.000000e+00 : f32
    %14 = vector.broadcast %cst_7 : f32 to vector<8x1xf32>
    %15 = arith.maximumf %13, %14 : vector<8x1xf32>
    %cst_8 = arith.constant 9.99999997E-7 : f32
    %16 = vector.broadcast %cst_8 : f32 to vector<8x1xf32>
    %17 = arith.addf %15, %16 : vector<8x1xf32>
    %18 = math.rsqrt %17 : vector<8x1xf32>
    %19 = vector.broadcast %9 : vector<8x1xf32> to vector<8x4xf32>
    %20 = arith.subf %2, %19 : vector<8x4xf32>
    %21 = vector.broadcast %18 : vector<8x1xf32> to vector<8x4xf32>
    %22 = arith.mulf %20, %21 : vector<8x4xf32>
    %c0_9 = arith.constant 0 : index
    %c0_10 = arith.constant 0 : index
    %c0_11 = arith.constant 0 : index
    %23 = vector.load %arg3[%c0_9, %c0_10, %c0_11] : memref<4x4x128xf32, #tpu.memory_space<vmem>>, vector<1x4x128xf32>
    %24 = vector.shape_cast %23 : vector<1x4x128xf32> to vector<4x128xf32>
    %cst_12 = arith.constant dense<0.000000e+00> : vector<8x128xf32>
    %25 = tpu.matmul %22, %24, %cst_12 {dimension_numbers = #tpu.dot_dimension_numbers<[1], [0], [0], [1], [0, 0, 1, 1], [], []>} : vector<8x4xf32>, vector<4x128xf32>, vector<8x128xf32> -> vector<8x128xf32>
    %26 = arith.addf %0, %25 : vector<8x128xf32>
    %c0_13 = arith.constant 0 : index
    %c1 = arith.constant 1 : index
    %c0_14 = arith.constant 0 : index
    %c0_15 = arith.constant 0 : index
    %27 = vector.load %arg2[%c0_13, %c1, %c0_14, %c0_15] : memref<1x4x8x4xf32, #tpu.memory_space<vmem>>, vector<1x1x8x4xf32>
    %28 = vector.shape_cast %27 : vector<1x1x8x4xf32> to vector<8x4xf32>
    %cst_16 = arith.constant dense<0.000000e+00> : vector<8xf32>
    %29 = vector.multi_reduction <add>, %28, %cst_16 [1] : vector<8x4xf32> to vector<8xf32>
    %30 = vector.shape_cast %29 : vector<8xf32> to vector<8x1xf32>
    %31 = arith.mulf %28, %28 : vector<8x4xf32>
    %cst_17 = arith.constant dense<0.000000e+00> : vector<8xf32>
    %32 = vector.multi_reduction <add>, %31, %cst_17 [1] : vector<8x4xf32> to vector<8xf32>
    %33 = vector.shape_cast %32 : vector<8xf32> to vector<8x1xf32>
    %cst_18 = arith.constant 2.500000e-01 : f32
    %34 = vector.broadcast %cst_18 : f32 to vector<8x1xf32>
    %35 = arith.mulf %30, %34 : vector<8x1xf32>
    %cst_19 = arith.constant 2.500000e-01 : f32
    %36 = vector.broadcast %cst_19 : f32 to vector<8x1xf32>
    %37 = arith.mulf %33, %36 : vector<8x1xf32>
    %38 = arith.mulf %35, %35 : vector<8x1xf32>
    %39 = arith.subf %37, %38 : vector<8x1xf32>
    %cst_20 = arith.constant 0.000000e+00 : f32
    %40 = vector.broadcast %cst_20 : f32 to vector<8x1xf32>
    %41 = arith.maximumf %39, %40 : vector<8x1xf32>
    %cst_21 = arith.constant 9.99999997E-7 : f32
    %42 = vector.broadcast %cst_21 : f32 to vector<8x1xf32>
    %43 = arith.addf %41, %42 : vector<8x1xf32>
    %44 = math.rsqrt %43 : vector<8x1xf32>
    %45 = vector.broadcast %35 : vector<8x1xf32> to vector<8x4xf32>
    %46 = arith.subf %28, %45 : vector<8x4xf32>
    %47 = vector.broadcast %44 : vector<8x1xf32> to vector<8x4xf32>
    %48 = arith.mulf %46, %47 : vector<8x4xf32>
    %c1_22 = arith.constant 1 : index
    %c0_23 = arith.constant 0 : index
    %c0_24 = arith.constant 0 : index
    %49 = vector.load %arg3[%c1_22, %c0_23, %c0_24] : memref<4x4x128xf32, #tpu.memory_space<vmem>>, vector<1x4x128xf32>
    %50 = vector.shape_cast %49 : vector<1x4x128xf32> to vector<4x128xf32>
    %cst_25 = arith.constant dense<0.000000e+00> : vector<8x128xf32>
    %51 = tpu.matmul %48, %50, %cst_25 {dimension_numbers = #tpu.dot_dimension_numbers<[1], [0], [0], [1], [0, 0, 1, 1], [], []>} : vector<8x4xf32>, vector<4x128xf32>, vector<8x128xf32> -> vector<8x128xf32>
    %52 = arith.addf %26, %51 : vector<8x128xf32>
    %c0_26 = arith.constant 0 : index
    %c2 = arith.constant 2 : index
    %c0_27 = arith.constant 0 : index
    %c0_28 = arith.constant 0 : index
    %53 = vector.load %arg2[%c0_26, %c2, %c0_27, %c0_28] : memref<1x4x8x4xf32, #tpu.memory_space<vmem>>, vector<1x1x8x4xf32>
    %54 = vector.shape_cast %53 : vector<1x1x8x4xf32> to vector<8x4xf32>
    %cst_29 = arith.constant dense<0.000000e+00> : vector<8xf32>
    %55 = vector.multi_reduction <add>, %54, %cst_29 [1] : vector<8x4xf32> to vector<8xf32>
    %56 = vector.shape_cast %55 : vector<8xf32> to vector<8x1xf32>
    %57 = arith.mulf %54, %54 : vector<8x4xf32>
    %cst_30 = arith.constant dense<0.000000e+00> : vector<8xf32>
    %58 = vector.multi_reduction <add>, %57, %cst_30 [1] : vector<8x4xf32> to vector<8xf32>
    %59 = vector.shape_cast %58 : vector<8xf32> to vector<8x1xf32>
    %cst_31 = arith.constant 2.500000e-01 : f32
    %60 = vector.broadcast %cst_31 : f32 to vector<8x1xf32>
    %61 = arith.mulf %56, %60 : vector<8x1xf32>
    %cst_32 = arith.constant 2.500000e-01 : f32
    %62 = vector.broadcast %cst_32 : f32 to vector<8x1xf32>
    %63 = arith.mulf %59, %62 : vector<8x1xf32>
    %64 = arith.mulf %61, %61 : vector<8x1xf32>
    %65 = arith.subf %63, %64 : vector<8x1xf32>
    %cst_33 = arith.constant 0.000000e+00 : f32
    %66 = vector.broadcast %cst_33 : f32 to vector<8x1xf32>
    %67 = arith.maximumf %65, %66 : vector<8x1xf32>
    %cst_34 = arith.constant 9.99999997E-7 : f32
    %68 = vector.broadcast %cst_34 : f32 to vector<8x1xf32>
    %69 = arith.addf %67, %68 : vector<8x1xf32>
    %70 = math.rsqrt %69 : vector<8x1xf32>
    %71 = vector.broadcast %61 : vector<8x1xf32> to vector<8x4xf32>
    %72 = arith.subf %54, %71 : vector<8x4xf32>
    %73 = vector.broadcast %70 : vector<8x1xf32> to vector<8x4xf32>
    %74 = arith.mulf %72, %73 : vector<8x4xf32>
    %c2_35 = arith.constant 2 : index
    %c0_36 = arith.constant 0 : index
    %c0_37 = arith.constant 0 : index
    %75 = vector.load %arg3[%c2_35, %c0_36, %c0_37] : memref<4x4x128xf32, #tpu.memory_space<vmem>>, vector<1x4x128xf32>
    %76 = vector.shape_cast %75 : vector<1x4x128xf32> to vector<4x128xf32>
    %cst_38 = arith.constant dense<0.000000e+00> : vector<8x128xf32>
    %77 = tpu.matmul %74, %76, %cst_38 {dimension_numbers = #tpu.dot_dimension_numbers<[1], [0], [0], [1], [0, 0, 1, 1], [], []>} : vector<8x4xf32>, vector<4x128xf32>, vector<8x128xf32> -> vector<8x128xf32>
    %78 = arith.addf %52, %77 : vector<8x128xf32>
    %c0_39 = arith.constant 0 : index
    %c3 = arith.constant 3 : index
    %c0_40 = arith.constant 0 : index
    %c0_41 = arith.constant 0 : index
    %79 = vector.load %arg2[%c0_39, %c3, %c0_40, %c0_41] : memref<1x4x8x4xf32, #tpu.memory_space<vmem>>, vector<1x1x8x4xf32>
    %80 = vector.shape_cast %79 : vector<1x1x8x4xf32> to vector<8x4xf32>
    %cst_42 = arith.constant dense<0.000000e+00> : vector<8xf32>
    %81 = vector.multi_reduction <add>, %80, %cst_42 [1] : vector<8x4xf32> to vector<8xf32>
    %82 = vector.shape_cast %81 : vector<8xf32> to vector<8x1xf32>
    %83 = arith.mulf %80, %80 : vector<8x4xf32>
    %cst_43 = arith.constant dense<0.000000e+00> : vector<8xf32>
    %84 = vector.multi_reduction <add>, %83, %cst_43 [1] : vector<8x4xf32> to vector<8xf32>
    %85 = vector.shape_cast %84 : vector<8xf32> to vector<8x1xf32>
    %cst_44 = arith.constant 2.500000e-01 : f32
    %86 = vector.broadcast %cst_44 : f32 to vector<8x1xf32>
    %87 = arith.mulf %82, %86 : vector<8x1xf32>
    %cst_45 = arith.constant 2.500000e-01 : f32
    %88 = vector.broadcast %cst_45 : f32 to vector<8x1xf32>
    %89 = arith.mulf %85, %88 : vector<8x1xf32>
    %90 = arith.mulf %87, %87 : vector<8x1xf32>
    %91 = arith.subf %89, %90 : vector<8x1xf32>
    %cst_46 = arith.constant 0.000000e+00 : f32
    %92 = vector.broadcast %cst_46 : f32 to vector<8x1xf32>
    %93 = arith.maximumf %91, %92 : vector<8x1xf32>
    %cst_47 = arith.constant 9.99999997E-7 : f32
    %94 = vector.broadcast %cst_47 : f32 to vector<8x1xf32>
    %95 = arith.addf %93, %94 : vector<8x1xf32>
    %96 = math.rsqrt %95 : vector<8x1xf32>
    %97 = vector.broadcast %87 : vector<8x1xf32> to vector<8x4xf32>
    %98 = arith.subf %80, %97 : vector<8x4xf32>
    %99 = vector.broadcast %96 : vector<8x1xf32> to vector<8x4xf32>
    %100 = arith.mulf %98, %99 : vector<8x4xf32>
    %c3_48 = arith.constant 3 : index
    %c0_49 = arith.constant 0 : index
    %c0_50 = arith.constant 0 : index
    %101 = vector.load %arg3[%c3_48, %c0_49, %c0_50] : memref<4x4x128xf32, #tpu.memory_space<vmem>>, vector<1x4x128xf32>
    %102 = vector.shape_cast %101 : vector<1x4x128xf32> to vector<4x128xf32>
    %cst_51 = arith.constant dense<0.000000e+00> : vector<8x128xf32>
    %103 = tpu.matmul %100, %102, %cst_51 {dimension_numbers = #tpu.dot_dimension_numbers<[1], [0], [0], [1], [0, 0, 1, 1], [], []>} : vector<8x4xf32>, vector<4x128xf32>, vector<8x128xf32> -> vector<8x128xf32>
    %104 = arith.addf %78, %103 : vector<8x128xf32>
    %c0_52 = arith.constant 0 : index
    %c0_53 = arith.constant 0 : index
    %105 = vector.load %arg4[%c0_52, %c0_53] : memref<1x128xf32, #tpu.memory_space<vmem>>, vector<1x128xf32>
    %106 = vector.broadcast %105 : vector<1x128xf32> to vector<8x128xf32>
    %107 = arith.addf %104, %106 : vector<8x128xf32>
    %c0_54 = arith.constant 0 : index
    %c0_55 = arith.constant 0 : index
    %c0_56 = arith.constant 0 : index
    %108 = vector.load %arg5[%c0_54, %c0_55, %c0_56] : memref<1x8x128xf32, #tpu.memory_space<vmem>>, vector<1x8x128xf32>
    %109 = vector.shape_cast %108 : vector<1x8x128xf32> to vector<8x128xf32>
    %110 = vector.shape_cast %107 : vector<8x128xf32> to vector<1x8x128xf32>
    tpu.vector_store %arg5[%c0_54, %c0_55, %c0_56], %110 {strides = array<i32>} : memref<1x8x128xf32, #tpu.memory_space<vmem>>, vector<1x8x128xf32>,
    return
  }
  func.func @transform_0(%arg0: i32, %arg1: i32) -> (i32, i32, i32, i32) {
    %c0_i32 = arith.constant 0 : i32
    %c0_i32_0 = arith.constant 0 : i32
    %c0_i32_1 = arith.constant 0 : i32
    return %arg0, %c0_i32, %arg1, %c0_i32_0 : i32, i32, i32, i32
  }
  func.func @transform_1(%arg0: i32, %arg1: i32) -> (i32, i32, i32) {
    %c0_i32 = arith.constant 0 : i32
    %c0_i32_0 = arith.constant 0 : i32
    %c0_i32_1 = arith.constant 0 : i32
    %c0_i32_2 = arith.constant 0 : i32
    return %c0_i32, %c0_i32_0, %c0_i32_1 : i32, i32, i32
  }
  func.func @transform_2(%arg0: i32, %arg1: i32) -> (i32, i32) {
    %c0_i32 = arith.constant 0 : i32
    %c0_i32_0 = arith.constant 0 : i32
    %c0_i32_1 = arith.constant 0 : i32
    return %c0_i32, %c0_i32_0 : i32, i32
  }
  func.func @transform_3(%arg0: i32, %arg1: i32) -> (i32, i32, i32) {
    %c0_i32 = arith.constant 0 : i32
    %c0_i32_0 = arith.constant 0 : i32
    return %arg0, %arg1, %c0_i32 : i32, i32, i32
  }
}

</mosaic_0001>

<bundles_post_ra>
// kernel: tpu_custom_call.1
= control target key start
LH: loop header
LB: loop body
LE: loop exit
PB: predicated region body
PF: predicated region fallthrough
CT: control target
= control target key end

     0   :  { %8 = vsyncpa [#allocation4], 0  ;;  %s990_s0 = inlined_call_operand.vmem [shape: f32[2,4,64,4], index: 0, kind: input, shape index: {}]   ;;  %s991_s1 = inlined_call_operand.vmem [shape: f32[4,4,128], index: 1, kind: input, shape index: {}]   ;;  %s992_s2 = inlined_call_operand.vmem [shape: f32[1,128], index: 2, kind: input, shape index: {}]   ;;  %s993_s3 = inlined_call_operand.hbm [shape: f32[2,64,128], index: 3, kind: output, shape index: {}]  }
   0x1   :  { %10 = vsyncpa [#allocation4 + $0x1], 0  ;;  %s785_s12 = smov 0   ;;  %s787_s13 = smov 0  }
   0x2   :  { %s789_s14 = smov 0   ;;  %s791_s15 = smov 0  }
   0x3   :  { %s793_s16 = smov 0   ;;  %s795_s17 = smov 0  }
   0x4   :  { %s797_s18 = smov 0   ;;  %s799_s19 = smov 0  }
   0x5 LB: > { %s560_s20 = sadd.s32 4294967295, %s763_s19   ;;  %s561_s21 = sadd.s32 4294967294, %s763_s19   ;;  %s763_s19 = sphi %s799_s19, %s16_s19   ;;  %s759_s18 = sphi %s797_s18, %s1003_s18   ;;  %s755_s17 = sphi %s795_s17, %s1002_s17   ;;  %s751_s16 = sphi %s793_s16, %s1001_s16   ;;  %s747_s15 = sphi %s791_s15, %s1000_s15   ;;  %s743_s14 = sphi %s789_s14, %s999_s14   ;;  %s739_s13 = sphi %s787_s13, %s998_s13   ;;  %s735_s12 = sphi %s785_s12, %s997_s12  }
   0x6   : > { %s25_s22 = sadd.s32 1, %s755_s17  ;;  %s28_s23 = sadd.s32 1, %s759_s18 }
   0x7   : > { %p26_p0 = scmp.ge.s32.totalorder %s25_s22, 8  ;;  %p44_p1 = scmp.ne.s32.totalorder %s743_s14, %s739_s13 }
   0x8   : > { %p45_p2 = scmp.eq.s32.totalorder %s763_s19, 0  ;;  %p118_p5 = scmp.eq.s32.totalorder %s560_s20, 15 }
   0x9   : > { %s1005_s22 = smov (%p26_p0, %s25_s22), 0  ;;  %s1007_s23 = smov (!%p26_p0, %s28_s23), %s759_s18 }
   0xa   : > { %s33_s24 = ssub.s32 %s755_s17, %s1005_s22  ;;  %p837_p3 = por %p45_p2, %p44_p1 }
   0xb   : > { %p30_p4 = scmp.ge.s32.totalorder %s1007_s23, 2  ;;  %p123_p6 = scmp.ne.s32.totalorder %s739_s13, %s735_s12 }
   0xc   : > { %p124_p7 = scmp.eq.s32.totalorder %s561_s21, 15  ;;  %p845_p8 = por %p118_p5, %p44_p1 }
   0xd   : > { %s1009_s23 = smov (%p30_p4, %s1007_s23), 0  ;;  %s37_s30 = sadd.s32 1, %s743_s14 }
   0xe   : > { %p849_p9 = por %p124_p7, %p123_p6  ;;  %s32_s28 = ssub.s32 %s759_s18, %s1009_s23 }
   0xf   : > { %s34_s29 = sor.u32 %s33_s24, %s32_s28  ;;  %p563_p11 = scmp.ge.s32.totalorder %s763_s19, 16 }
  0x10   : > { %p35_p10 = scmp.eq.s32.totalorder %s34_s29, 0 }
  0x11   : > { %146 = sbr.rel (%p563_p11) target bundleno = 32 (0x20), region = 24 }
  0x12   : > { %s857_s4 = scalar_select %p35_p10, %s743_s14, %s37_s30  }
  0x16   : > { %149 = sbr.rel (!%p837_p3) target bundleno = 32 (0x20), region = 28  ;;  %s151_s5 = sand.u32 (%p837_p3), 1, %s743_s14  }
  0x17   : > { %s565_s6 = sshll.u32 (%p837_p3), %s759_s18, 5  ;;  %s564_s7 = sshll.u32 (%p837_p3), %s151_s5, 5 }
  0x18   : > { %s155_s8 = sadd.s32 (%p837_p3), %s755_s17, %s565_s6  ;;  %s153_s21 = scalar_lea.vmem (%p837_p3), [#allocation2], %s564_s7 }
  0x19   : > { %s566_s9 = sshll.u32 (%p837_p3), %s155_s8, 3 }
  0x1a   : > { %s157_s20 = scalar_lea.vmem (%p837_p3), %s990_s0, %s566_s9 }
  0x1b   : > { %v192_v0 = vld [vmem:[%s157_s20] sm:$0xff] }
  0x1c   : > { %v194_v1 = vld [vmem:[%s157_s20 + $0x40] sm:$0xff]  ;;  %193 = vst [vmem:[%s153_s21] sm:$0xff] %v192_v0 }
  0x1d   : > { %v196_v2 = vld [vmem:[%s157_s20 + $0x80] sm:$0xff]  ;;  %195 = vst [vmem:[%s153_s21 + $0x8] sm:$0xff] %v194_v1 }
  0x1e   : > { %v198_v3 = vld [vmem:[%s157_s20 + $0xc0] sm:$0xff]  ;;  %197 = vst [vmem:[%s153_s21 + $0x10] sm:$0xff] %v196_v2 }
  0x1f   : > { %199 = vst [vmem:[%s153_s21 + $0x18] sm:$0xff] %v198_v3 }
  0x20 PF: > { %p567_p12 = scmp.ge.s32.totalorder %s763_s19, 1  ;;  %p204_p13 = scmp.lt.s32.totalorder %s763_s19, 17 }
  0x22   : > { %p205_p0 = pnand %p567_p12, %p204_p13 }
  0x23   : > { %s871_s24 = sand.u32 (!%p205_p0), 1, %s739_s13   ;;  %s585_s11 = sshll.u32 (!%p205_p0), %s751_s16, 3 }
  0x24   : > { %208 = sbr.rel (%p205_p0) target bundleno = 341 (0x155), region = 66  ;;  %s568_s25 = sshll.u32 (!%p205_p0), %s871_s24, 5 }
  0x25   : > { %s213_s28 = scalar_lea.vmem (!%p205_p0), [#allocation2], %s568_s25  ;;  %s473_s20 = sadd.s32 (!%p205_p0), %s747_s15, %s585_s11 }
  0x26   : > { %s569_s21 = sshll.u32 (!%p205_p0), %s871_s24, 3  ;;  %s586_s25 = sshll.u32 (!%p205_p0), %s473_s20, 3 }
  0x27   : > { %s475_s30 = scalar_lea.hbm (!%p205_p0), %s993_s3, %s586_s25  ;;  %s233_s16 = scalar_lea.vmem (!%p205_p0), [#allocation3], %s569_s21 }
  0x28   : > { %s477_s15 = sshll.u32 (!%p205_p0), %s233_s16, 4  ;;  %s479_s7 = sshll.u32 (!%p205_p0), %s475_s30, 4  ;;  %s478_s15 = int_to_ptr.vmem [resolvable:$true] %s477_s15  ;;  %s480_s7 = int_to_ptr.hbm [resolvable:$true] %s479_s7 }
  0x29   : > { %vm235_vm0 = vcmask 31744   ;;  %v874_v4 = vld [vmem:[%s213_s28 + $0x18] sm:$0xff]  ;;  %v876_v5 = vld [vmem:[%s213_s28 + $0x10] sm:$0xff]  ;;  %v878_v6 = vld [vmem:[%s213_s28 + $0x8] sm:$0xff]  ;;  %vm294_vm1 = vcmask 1043456   ;;  %s463_s8 = scalar_lea.sflag [#allocation4], %s871_s24 }
  0x2a   : > { %v402_v7 = vsel %vm235_vm0, %v874_v4, 0.0  ;;  %v346_v8 = vsel %vm235_vm0, %v876_v5, 0.0  ;;  %v264_v9 = vsel %vm235_vm0, %v878_v6, 0.0  ;;  %v349_v10 = vmul.f32 %v876_v5, %v876_v5  ;;  %v890_v12 = vld [vmem:[%s213_s28] sm:$0xff]  ;;  %v577_v23 = vld [vmem:[%s991_s1 + $0x8] sm:$0xf] }
  0x2b   : > { %403 = vadd.xlane.f32.xlu1 %v402_v7  ;;  %347 = vadd.xlane.f32.xlu0 %v346_v8  ;;  %v405_v11 = vmul.f32 %v874_v4, %v874_v4  ;;  %v236_v14 = vsel %vm235_vm0, %v890_v12, 0.0  ;;  %v239_v16 = vmul.f32 %v890_v12, %v890_v12  ;;  %v267_v17 = vmul.f32 %v878_v6, %v878_v6  ;;  %v581_v24 = vld [vmem:[%s991_s1 + $0xc] sm:$0xf]  ;;  %v571_v27 = vld [vmem:[%s991_s1 + $0x4] sm:$0xf]  ;;  %s683_s9 = sshra.s32 %s480_s7, 4  ;;  %s684_s9 = int_to_ptr.hbm [resolvable:$true] %s683_s9 }
  0x2c   : > { %265 = vadd.xlane.f32.xlu2 %v264_v9  ;;  %v350_v13 = vsel %vm235_vm0, %v349_v10, 0.0  ;;  %578 = vmatpush.msk.msra.mxu2 %vm294_vm1, %v577_v23  ;;  %v261_v28 = vld [vmem:[%s991_s1] sm:$0xf]  ;;  %s685_s10 = scalar_lea.hbm %s684_s9, 8  ;;  %s689_s25 = scalar_lea.hbm %s993_s3, 128 }
  0x2d   : > { %v406_v15 = vsel %vm235_vm0, %v405_v11, 0.0  ;;  %v240_v18 = vsel %vm235_vm0, %v239_v16, 0.0  ;;  %v268_v19 = vsel %vm235_vm0, %v267_v17, 0.0  ;;  %582 = vmatpush.msk.msra.mxu3 %vm294_vm1, %v581_v24  ;;  %572 = vmatpush.msk.msra.mxu0 %vm294_vm1, %v571_v27  ;;  %p686_p1 = scmp.ne.s32.totalorder %s684_s9, %s685_s10  ;;  %p690_p4 = scmp.lt.s32.totalorder %s684_s9, %s993_s3 }
  0x2e   : > { %574 = vmatpush.msk.msra.mxu1 %vm294_vm1, %v261_v28  ;;  %p691_p5 = scmp.lt.s32.totalorder %s689_s25, %s685_s10 }
  0x2f   : > { %p687_p2 = pnand %p686_p1, %p845_p8 }
  0x30   : > { %p692_p6 = por %p691_p5, %p690_p4 }
  0x31   : > { %p688_p3 = pneg %p687_p2 }
  0x33   : > { %351 = vadd.xlane.f32.xlu0 %v350_v13  ;;  %237 = vadd.xlane.f32.xlu1 %v236_v14  ;;  %p693_p7 = pnand %p692_p6, %p688_p3 }
  0x34   : > { %407 = vadd.xlane.f32.xlu2 %v406_v15 }
  0x3b   : > { %241 = vadd.xlane.f32.xlu0 %v240_v18  ;;  %269 = vadd.xlane.f32.xlu1 %v268_v19 }
  0x9e   : > { %v404_v20 = vpop.xlane.xlu1 %403  ;;  %v348_v21 = vpop.xlane.xlu0 %347 }
  0x9f   : > { %v266_v22 = vpop.xlane.xlu2 %265  ;;  %v908_v25 = vmul.f32 0.25, %v348_v21  ;;  %v910_v26 = vmul.f32 0.25, %v404_v20 }
  0xa0   : > { %v922_v37 = vmul.f32 0.25, %v266_v22 }
  0xa1   : > { %v355_v31 = vmul.f32 %v908_v25, %v908_v25  ;;  %v411_v34 = vmul.f32 %v910_v26, %v910_v26  ;;  %v369_v9 = vsub.f32 %v876_v5, %v908_v25  ;;  %v425_v13 = vsub.f32 %v874_v4, %v910_v26 }
  0xa2   : > { %v273_v43 = vmul.f32 %v922_v37, %v922_v37  ;;  %v287_v25 = vsub.f32 %v878_v6, %v922_v37 }
  0xa6   : > { %v352_v29 = vpop.xlane.xlu0 %351  ;;  %v238_v30 = vpop.xlane.xlu1 %237 }
  0xa7   : > { %v354_v32 = vmul.f32 0.25, %v352_v29  ;;  %v408_v33 = vpop.xlane.xlu2 %407  ;;  %v924_v40 = vmul.f32 0.25, %v238_v30 }
  0xa8   : > { %v410_v35 = vmul.f32 0.25, %v408_v33  ;;  %v660_v33 = vld [vmem:[%s992_s2] ss:$0 sm:$0xff] }
  0xa9   : > { %v356_v36 = vsub.f32 %v354_v32, %v355_v31  ;;  %v245_v47 = vmul.f32 %v924_v40, %v924_v40  ;;  %v259_v23 = vsub.f32 %v890_v12, %v924_v40 }
  0xaa   : > { %v412_v38 = vsub.f32 %v410_v35, %v411_v34 }
  0xab   : > { %v357_v39 = vmax.f32 %v356_v36, 0.0 }
  0xac   : > { %v413_v41 = vmax.f32 %v412_v38, 0.0 }
  0xad   : > { %v358_v42 = vadd.f32 1e-06, %v357_v39 }
  0xae   : > { %v414_v44 = vadd.f32 1e-06, %v413_v41  ;;  %v242_v45 = vpop.xlane.xlu0 %241  ;;  %v270_v46 = vpop.xlane.xlu1 %269 }
  0xaf   : > { %661 = vrsqrt.f32 %v358_v42  ;;  %v244_v48 = vmul.f32 0.25, %v242_v45  ;;  %v272_v49 = vmul.f32 0.25, %v270_v46  ;;  %vm365_vm4 = vweird.f32 %v358_v42 }
  0xb0   : > { %663 = vrsqrt.f32 %v414_v44  ;;  %vm421_vm5 = vweird.f32 %v414_v44 }
  0xb1   : > { %v246_v50 = vsub.f32 %v244_v48, %v245_v47  ;;  %v274_v51 = vsub.f32 %v272_v49, %v273_v43 }
  0xb3   : > { %v247_v52 = vmax.f32 %v246_v50, 0.0  ;;  %v275_v53 = vmax.f32 %v274_v51, 0.0 }
  0xb5   : > { %v662_v54 = vpop.eup %661  ;;  %v248_v55 = vadd.f32 1e-06, %v247_v52  ;;  %v276_v56 = vadd.f32 1e-06, %v275_v53 }
  0xb6   : > { %v664_v57 = vpop.eup %663  ;;  %v360_v58 = vmul.f32 %v662_v54, %v358_v42  ;;  %vm366_vm2 = vweird.f32 %v662_v54 }
  0xb7   : > { %v416_v59 = vmul.f32 %v664_v57, %v414_v44  ;;  %665 = vrsqrt.f32 %v248_v55  ;;  %vm422_vm3 = vweird.f32 %v664_v57  ;;  %vm367_vm6 = vmor %vm365_vm4, %vm366_vm2  ;;  %vm255_vm10 = vweird.f32 %v248_v55 }
  0xb8   : > { %v361_v60 = vmul.f32 %v662_v54, %v360_v58  ;;  %667 = vrsqrt.f32 %v276_v56  ;;  %vm423_vm7 = vmor %vm421_vm5, %vm422_vm3  ;;  %vm283_vm11 = vweird.f32 %v276_v56 }
  0xb9   : > { %v417_v61 = vmul.f32 %v664_v57, %v416_v59 }
  0xba   : > { %v362_v62 = vmul.f32 0.5, %v361_v60 }
  0xbb   : > { %v418_v63 = vmul.f32 0.5, %v417_v61 }
  0xbc   : > { %v363_v0 = vsub.f32 1.5, %v362_v62 }
  0xbd   : > { %v666_v1 = vpop.eup %665  ;;  %v419_v2 = vsub.f32 1.5, %v418_v63 }
  0xbe   : > { %v668_v3 = vpop.eup %667  ;;  %v250_v7 = vmul.f32 %v666_v1, %v248_v55  ;;  %v364_v8 = vmul.f32 %v662_v54, %v363_v0  ;;  %vm256_vm8 = vweird.f32 %v666_v1 }
  0xbf   : > { %v278_v10 = vmul.f32 %v668_v3, %v276_v56  ;;  %v420_v11 = vmul.f32 %v664_v57, %v419_v2  ;;  %vm284_vm9 = vweird.f32 %v668_v3  ;;  %vm257_vm12 = vmor %vm255_vm10, %vm256_vm8 }
  0xc0   : > { %v251_v14 = vmul.f32 %v666_v1, %v250_v7  ;;  %v368_v15 = vsel %vm367_vm6, %v662_v54, %v364_v8  ;;  %vm285_vm13 = vmor %vm283_vm11, %vm284_vm9 }
  0xc1   : > { %v279_v16 = vmul.f32 %v668_v3, %v278_v10  ;;  %v370_v17 = vmul.f32 %v369_v9, %v368_v15  ;;  %v424_v18 = vsel %vm423_vm7, %v664_v57, %v420_v11 }
  0xc2   : > { %v252_v19 = vmul.f32 0.5, %v251_v14  ;;  %v426_v20 = vmul.f32 %v425_v13, %v424_v18 }
  0xc3   : > { %v280_v21 = vmul.f32 0.5, %v279_v16  ;;  %579 = vmatmul.msk.f32.vlgmr.msra.gmra.mxu2 %vm235_vm0, %v370_v17 }
  0xc4   : > { %v253_v22 = vsub.f32 1.5, %v252_v19  ;;  %583 = vmatmul.msk.f32.vlgmr.msra.gmra.mxu3 %vm235_vm0, %v426_v20 }
  0xc5   : > { %v281_v5 = vsub.f32 1.5, %v280_v21 }
  0xc6   : > { %v254_v4 = vmul.f32 %v666_v1, %v253_v22 }
  0xc7   : > { %v282_v24 = vmul.f32 %v668_v3, %v281_v5 }
  0xc8   : > { %v258_v26 = vsel %vm257_vm12, %v666_v1, %v254_v4 }
  0xc9   : > { %v286_v27 = vsel %vm285_vm13, %v668_v3, %v282_v24  ;;  %v260_v28 = vmul.f32 %v259_v23, %v258_v26 }
  0xca   : > { %v288_v29 = vmul.f32 %v287_v25, %v286_v27 }
  0xcb   : > { %575 = vmatmul.msk.f32.vlgmr.msra.gmra.mxu1 %vm235_vm0, %v260_v28 }
  0xcc   : > { %573 = vmatmul.msk.f32.vlgmr.msra.gmra.mxu0 %vm235_vm0, %v288_v29 }
 0x146   : > { %v396_v6 = vpop.f32.mrf.mxu2 }
 0x147   : > { %v452_v34 = vpop.f32.mrf.mxu3 }
 0x148   : > { %v341_v12 = vpop.f32.mrf.mxu1 }
 0x149   : > { %v315_v30 = vpop.f32.mrf.mxu0 }
 0x14a   : > { %v342_v31 = vadd.f32 %v341_v12, %v315_v30 }
 0x14c   : > { %v399_v32 = vadd.f32 %v396_v6, %v342_v31 }
 0x14e   : > { %v455_v35 = vadd.f32 %v452_v34, %v399_v32 }
 0x150   : > { %v460_v36 = vadd.f32 %v660_v33, %v455_v35 }
 0x152   : > { %461 = vst [vmem:[%s233_s16] sm:$0xff] %v460_v36 }
 0x153   : > { %696 = shalt.err (!%p693_p7)
}
 0x154   : > { %589 = dma.vmem_to_hbm [thread:$0]  (%p845_p8), %s478_s15, 128, %s480_s7, %s463_s8  }
 0x155 PF: > { %p595_p10 = scmp.ge.s32.totalorder %s763_s19, 2  ;;  %s491_s24 = sand.u32 1, %s735_s12  }
 0x156   : > { %s492_s29 = scalar_lea.sflag [#allocation4], %s491_s24 }
 0x157   : > { %p592_p11 = pnand %p595_p10, %p849_p9 }
 0x159   : > { %p593_p12 = pneg %p592_p11 }
 0x15b   : > { %730 = dma.done.wait (%p593_p12), %s492_s29, 128  }
 0x15c   : > { %732 = vsyncadd (%p593_p12), %s492_s29, 4294967168  ;;  %s16_s19 = sadd.s32 1, %s763_s19   ;;  %s997_s12 = smov %s739_s13 }
 0x15d   : > { %p13_p13 = scmp.ge.s32.totalorder %s16_s19, 18   ;;  %s998_s13 = smov %s743_s14 }
 0x15e   : > { %s999_s14 = smov %s857_s4  ;;  %s1000_s15 = smov %s755_s17 }
 0x15f   : > { %s1001_s16 = smov %s759_s18  ;;  %s1002_s17 = smov %s1005_s22 }
 0x160   : > { %s1003_s18 = smov %s1009_s23  ;;  %15 = sbr.rel (!%p13_p13) target bundleno = 5 (0x5), region = 116 }
 0x165   :  { %498 = vsyncpa [#allocation4], 1 }
 0x166   :  { %500 = vsyncpa [#allocation4 + $0x1], 1 }

// kernel: tpu_custom_call.1
= control target key start
LH: loop header
LB: loop body
LE: loop exit
PB: predicated region body
PF: predicated region fallthrough
CT: control target
= control target key end

     0   :  { %8 = vsyncpa [#allocation4], 0  ;;  %s990_s0 = inlined_call_operand.vmem [shape: f32[2,4,64,4], index: 0, kind: input, shape index: {}]   ;;  %s991_s1 = inlined_call_operand.vmem [shape: f32[4,4,128], index: 1, kind: input, shape index: {}]   ;;  %s992_s2 = inlined_call_operand.vmem [shape: f32[1,128], index: 2, kind: input, shape index: {}]   ;;  %s993_s3 = inlined_call_operand.hbm [shape: f32[2,64,128], index: 3, kind: output, shape index: {}]  }
   0x1   :  { %10 = vsyncpa [#allocation4 + $0x1], 0  ;;  %s785_s12 = smov 0   ;;  %s787_s13 = smov 0  }
   0x2   :  { %s789_s14 = smov 0   ;;  %s791_s15 = smov 0  }
   0x3   :  { %s793_s16 = smov 0   ;;  %s795_s17 = smov 0  }
   0x4   :  { %s797_s18 = smov 0   ;;  %s799_s19 = smov 0  }
   0x5 LB: > { %s560_s20 = sadd.s32 4294967295, %s763_s19   ;;  %s561_s21 = sadd.s32 4294967294, %s763_s19   ;;  %s763_s19 = sphi %s799_s19, %s16_s19   ;;  %s759_s18 = sphi %s797_s18, %s1003_s18   ;;  %s755_s17 = sphi %s795_s17, %s1002_s17   ;;  %s751_s16 = sphi %s793_s16, %s1001_s16   ;;  %s747_s15 = sphi %s791_s15, %s1000_s15   ;;  %s743_s14 = sphi %s789_s14, %s999_s14   ;;  %s739_s13 = sphi %s787_s13, %s998_s13   ;;  %s735_s12 = sphi %s785_s12, %s997_s12  }
   0x6   : > { %s25_s22 = sadd.s32 1, %s755_s17  ;;  %s28_s23 = sadd.s32 1, %s759_s18 }
   0x7   : > { %p26_p0 = scmp.ge.s32.totalorder %s25_s22, 8  ;;  %p44_p1 = scmp.ne.s32.totalorder %s743_s14, %s739_s13 }
   0x8   : > { %p45_p2 = scmp.eq.s32.totalorder %s763_s19, 0  ;;  %p118_p5 = scmp.eq.s32.totalorder %s560_s20, 15 }
   0x9   : > { %s1005_s22 = smov (%p26_p0, %s25_s22), 0  ;;  %s1007_s23 = smov (!%p26_p0, %s28_s23), %s759_s18 }
   0xa   : > { %s33_s24 = ssub.s32 %s755_s17, %s1005_s22  ;;  %p837_p3 = por %p45_p2, %p44_p1 }
   0xb   : > { %p30_p4 = scmp.ge.s32.totalorder %s1007_s23, 2  ;;  %p123_p6 = scmp.ne.s32.totalorder %s739_s13, %s735_s12 }
   0xc   : > { %p124_p7 = scmp.eq.s32.totalorder %s561_s21, 15  ;;  %p845_p8 = por %p118_p5, %p44_p1 }
   0xd   : > { %s1009_s23 = smov (%p30_p4, %s1007_s23), 0  ;;  %s37_s30 = sadd.s32 1, %s743_s14 }
   0xe   : > { %p849_p9 = por %p124_p7, %p123_p6  ;;  %s32_s28 = ssub.s32 %s759_s18, %s1009_s23 }
   0xf   : > { %s34_s29 = sor.u32 %s33_s24, %s32_s28  ;;  %p563_p11 = scmp.ge.s32.totalorder %s763_s19, 16 }
  0x10   : > { %p35_p10 = scmp.eq.s32.totalorder %s34_s29, 0 }
  0x11   : > { %146 = sbr.rel (%p563_p11) target bundleno = 32 (0x20), region = 24 }
  0x12   : > { %s857_s4 = scalar_select %p35_p10, %s743_s14, %s37_s30  }
  0x16   : > { %149 = sbr.rel (!%p837_p3) target bundleno = 32 (0x20), region = 28  ;;  %s151_s5 = sand.u32 (%p837_p3), 1, %s743_s14  }
  0x17   : > { %s565_s6 = sshll.u32 (%p837_p3), %s759_s18, 5  ;;  %s564_s7 = sshll.u32 (%p837_p3), %s151_s5, 5 }
  0x18   : > { %s155_s8 = sadd.s32 (%p837_p3), %s755_s17, %s565_s6  ;;  %s153_s21 = scalar_lea.vmem (%p837_p3), [#allocation2], %s564_s7 }
  0x19   : > { %s566_s9 = sshll.u32 (%p837_p3), %s155_s8, 3 }
  0x1a   : > { %s157_s20 = scalar_lea.vmem (%p837_p3), %s990_s0, %s566_s9 }
  0x1b   : > { %v192_v0 = vld [vmem:[%s157_s20] sm:$0xff] }
  0x1c   : > { %v194_v1 = vld [vmem:[%s157_s20 + $0x40] sm:$0xff]  ;;  %193 = vst [vmem:[%s153_s21] sm:$0xff] %v192_v0 }
  0x1d   : > { %v196_v2 = vld [vmem:[%s157_s20 + $0x80] sm:$0xff]  ;;  %195 = vst [vmem:[%s153_s21 + $0x8] sm:$0xff] %v194_v1 }
  0x1e   : > { %v198_v3 = vld [vmem:[%s157_s20 + $0xc0] sm:$0xff]  ;;  %197 = vst [vmem:[%s153_s21 + $0x10] sm:$0xff] %v196_v2 }
  0x1f   : > { %199 = vst [vmem:[%s153_s21 + $0x18] sm:$0xff] %v198_v3 }
  0x20 PF: > { %p567_p12 = scmp.ge.s32.totalorder %s763_s19, 1  ;;  %p204_p13 = scmp.lt.s32.totalorder %s763_s19, 17 }
  0x22   : > { %p205_p0 = pnand %p567_p12, %p204_p13 }
  0x23   : > { %s871_s24 = sand.u32 (!%p205_p0), 1, %s739_s13   ;;  %s585_s11 = sshll.u32 (!%p205_p0), %s751_s16, 3 }
  0x24   : > { %208 = sbr.rel (%p205_p0) target bundleno = 341 (0x155), region = 66  ;;  %s568_s25 = sshll.u32 (!%p205_p0), %s871_s24, 5 }
  0x25   : > { %s213_s28 = scalar_lea.vmem (!%p205_p0), [#allocation2], %s568_s25  ;;  %s473_s20 = sadd.s32 (!%p205_p0), %s747_s15, %s585_s11 }
  0x26   : > { %s569_s21 = sshll.u32 (!%p205_p0), %s871_s24, 3  ;;  %s586_s25 = sshll.u32 (!%p205_p0), %s473_s20, 3 }
  0x27   : > { %s475_s30 = scalar_lea.hbm (!%p205_p0), %s993_s3, %s586_s25  ;;  %s233_s16 = scalar_lea.vmem (!%p205_p0), [#allocation3], %s569_s21 }
  0x28   : > { %s477_s15 = sshll.u32 (!%p205_p0), %s233_s16, 4  ;;  %s479_s7 = sshll.u32 (!%p205_p0), %s475_s30, 4  ;;  %s478_s15 = int_to_ptr.vmem [resolvable:$true] %s477_s15  ;;  %s480_s7 = int_to_ptr.hbm [resolvable:$true] %s479_s7 }
  0x29   : > { %vm235_vm0 = vcmask 31744   ;;  %v874_v4 = vld [vmem:[%s213_s28 + $0x18] sm:$0xff]  ;;  %v876_v5 = vld [vmem:[%s213_s28 + $0x10] sm:$0xff]  ;;  %v878_v6 = vld [vmem:[%s213_s28 + $0x8] sm:$0xff]  ;;  %vm294_vm1 = vcmask 1043456   ;;  %s463_s8 = scalar_lea.sflag [#allocation4], %s871_s24 }
  0x2a   : > { %v402_v7 = vsel %vm235_vm0, %v874_v4, 0.0  ;;  %v346_v8 = vsel %vm235_vm0, %v876_v5, 0.0  ;;  %v264_v9 = vsel %vm235_vm0, %v878_v6, 0.0  ;;  %v349_v10 = vmul.f32 %v876_v5, %v876_v5  ;;  %v890_v12 = vld [vmem:[%s213_s28] sm:$0xff]  ;;  %v577_v23 = vld [vmem:[%s991_s1 + $0x8] sm:$0xf] }
  0x2b   : > { %403 = vadd.xlane.f32.xlu1 %v402_v7  ;;  %347 = vadd.xlane.f32.xlu0 %v346_v8  ;;  %v405_v11 = vmul.f32 %v874_v4, %v874_v4  ;;  %v236_v14 = vsel %vm235_vm0, %v890_v12, 0.0  ;;  %v239_v16 = vmul.f32 %v890_v12, %v890_v12  ;;  %v267_v17 = vmul.f32 %v878_v6, %v878_v6  ;;  %v581_v24 = vld [vmem:[%s991_s1 + $0xc] sm:$0xf]  ;;  %v571_v27 = vld [vmem:[%s991_s1 + $0x4] sm:$0xf]  ;;  %s683_s9 = sshra.s32 %s480_s7, 4  ;;  %s684_s9 = int_to_ptr.hbm [resolvable:$true] %s683_s9 }
  0x2c   : > { %265 = vadd.xlane.f32.xlu2 %v264_v9  ;;  %v350_v13 = vsel %vm235_vm0, %v349_v10, 0.0  ;;  %578 = vmatpush.msk.msra.mxu2 %vm294_vm1, %v577_v23  ;;  %v261_v28 = vld [vmem:[%s991_s1] sm:$0xf]  ;;  %s685_s10 = scalar_lea.hbm %s684_s9, 8  ;;  %s689_s25 = scalar_lea.hbm %s993_s3, 128 }
  0x2d   : > { %v406_v15 = vsel %vm235_vm0, %v405_v11, 0.0  ;;  %v240_v18 = vsel %vm235_vm0, %v239_v16, 0.0  ;;  %v268_v19 = vsel %vm235_vm0, %v267_v17, 0.0  ;;  %582 = vmatpush.msk.msra.mxu3 %vm294_vm1, %v581_v24  ;;  %572 = vmatpush.msk.msra.mxu0 %vm294_vm1, %v571_v27  ;;  %p686_p1 = scmp.ne.s32.totalorder %s684_s9, %s685_s10  ;;  %p690_p4 = scmp.lt.s32.totalorder %s684_s9, %s993_s3 }
  0x2e   : > { %574 = vmatpush.msk.msra.mxu1 %vm294_vm1, %v261_v28  ;;  %p691_p5 = scmp.lt.s32.totalorder %s689_s25, %s685_s10 }
  0x2f   : > { %p687_p2 = pnand %p686_p1, %p845_p8 }
  0x30   : > { %p692_p6 = por %p691_p5, %p690_p4 }
  0x31   : > { %p688_p3 = pneg %p687_p2 }
  0x33   : > { %351 = vadd.xlane.f32.xlu0 %v350_v13  ;;  %237 = vadd.xlane.f32.xlu1 %v236_v14  ;;  %p693_p7 = pnand %p692_p6, %p688_p3 }
  0x34   : > { %407 = vadd.xlane.f32.xlu2 %v406_v15 }
  0x3b   : > { %241 = vadd.xlane.f32.xlu0 %v240_v18  ;;  %269 = vadd.xlane.f32.xlu1 %v268_v19 }
  0x9e   : > { %v404_v20 = vpop.xlane.xlu1 %403  ;;  %v348_v21 = vpop.xlane.xlu0 %347 }
  0x9f   : > { %v266_v22 = vpop.xlane.xlu2 %265  ;;  %v908_v25 = vmul.f32 0.25, %v348_v21  ;;  %v910_v26 = vmul.f32 0.25, %v404_v20 }
  0xa0   : > { %v922_v37 = vmul.f32 0.25, %v266_v22 }
  0xa1   : > { %v355_v31 = vmul.f32 %v908_v25, %v908_v25  ;;  %v411_v34 = vmul.f32 %v910_v26, %v910_v26  ;;  %v369_v9 = vsub.f32 %v876_v5, %v908_v25  ;;  %v425_v13 = vsub.f32 %v874_v4, %v910_v26 }
  0xa2   : > { %v273_v43 = vmul.f32 %v922_v37, %v922_v37  ;;  %v287_v25 = vsub.f32 %v878_v6, %v922_v37 }
  0xa6   : > { %v352_v29 = vpop.xlane.xlu0 %351  ;;  %v238_v30 = vpop.xlane.xlu1 %237 }
  0xa7   : > { %v354_v32 = vmul.f32 0.25, %v352_v29  ;;  %v408_v33 = vpop.xlane.xlu2 %407  ;;  %v924_v40 = vmul.f32 0.25, %v238_v30 }
  0xa8   : > { %v410_v35 = vmul.f32 0.25, %v408_v33  ;;  %v660_v33 = vld [vmem:[%s992_s2] ss:$0 sm:$0xff] }
  0xa9   : > { %v356_v36 = vsub.f32 %v354_v32, %v355_v31  ;;  %v245_v47 = vmul.f32 %v924_v40, %v924_v40  ;;  %v259_v23 = vsub.f32 %v890_v12, %v924_v40 }
  0xaa   : > { %v412_v38 = vsub.f32 %v410_v35, %v411_v34 }
  0xab   : > { %v357_v39 = vmax.f32 %v356_v36, 0.0 }
  0xac   : > { %v413_v41 = vmax.f32 %v412_v38, 0.0 }
  0xad   : > { %v358_v42 = vadd.f32 1e-06, %v357_v39 }
  0xae   : > { %v414_v44 = vadd.f32 1e-06, %v413_v41  ;;  %v242_v45 = vpop.xlane.xlu0 %241  ;;  %v270_v46 = vpop.xlane.xlu1 %269 }
  0xaf   : > { %661 = vrsqrt.f32 %v358_v42  ;;  %v244_v48 = vmul.f32 0.25, %v242_v45  ;;  %v272_v49 = vmul.f32 0.25, %v270_v46  ;;  %vm365_vm4 = vweird.f32 %v358_v42 }
  0xb0   : > { %663 = vrsqrt.f32 %v414_v44  ;;  %vm421_vm5 = vweird.f32 %v414_v44 }
  0xb1   : > { %v246_v50 = vsub.f32 %v244_v48, %v245_v47  ;;  %v274_v51 = vsub.f32 %v272_v49, %v273_v43 }
  0xb3   : > { %v247_v52 = vmax.f32 %v246_v50, 0.0  ;;  %v275_v53 = vmax.f32 %v274_v51, 0.0 }
  0xb5   : > { %v662_v54 = vpop.eup %661  ;;  %v248_v55 = vadd.f32 1e-06, %v247_v52  ;;  %v276_v56 = vadd.f32 1e-06, %v275_v53 }
  0xb6   : > { %v664_v57 = vpop.eup %663  ;;  %v360_v58 = vmul.f32 %v662_v54, %v358_v42  ;;  %vm366_vm2 = vweird.f32 %v662_v54 }
  0xb7   : > { %v416_v59 = vmul.f32 %v664_v57, %v414_v44  ;;  %665 = vrsqrt.f32 %v248_v55  ;;  %vm422_vm3 = vweird.f32 %v664_v57  ;;  %vm367_vm6 = vmor %vm365_vm4, %vm366_vm2  ;;  %vm255_vm10 = vweird.f32 %v248_v55 }
  0xb8   : > { %v361_v60 = vmul.f32 %v662_v54, %v360_v58  ;;  %667 = vrsqrt.f32 %v276_v56  ;;  %vm423_vm7 = vmor %vm421_vm5, %vm422_vm3  ;;  %vm283_vm11 = vweird.f32 %v276_v56 }
  0xb9   : > { %v417_v61 = vmul.f32 %v664_v57, %v416_v59 }
  0xba   : > { %v362_v62 = vmul.f32 0.5, %v361_v60 }
  0xbb   : > { %v418_v63 = vmul.f32 0.5, %v417_v61 }
  0xbc   : > { %v363_v0 = vsub.f32 1.5, %v362_v62 }
  0xbd   : > { %v666_v1 = vpop.eup %665  ;;  %v419_v2 = vsub.f32 1.5, %v418_v63 }
  0xbe   : > { %v668_v3 = vpop.eup %667  ;;  %v250_v7 = vmul.f32 %v666_v1, %v248_v55  ;;  %v364_v8 = vmul.f32 %v662_v54, %v363_v0  ;;  %vm256_vm8 = vweird.f32 %v666_v1 }
  0xbf   : > { %v278_v10 = vmul.f32 %v668_v3, %v276_v56  ;;  %v420_v11 = vmul.f32 %v664_v57, %v419_v2  ;;  %vm284_vm9 = vweird.f32 %v668_v3  ;;  %vm257_vm12 = vmor %vm255_vm10, %vm256_vm8 }
  0xc0   : > { %v251_v14 = vmul.f32 %v666_v1, %v250_v7  ;;  %v368_v15 = vsel %vm367_vm6, %v662_v54, %v364_v8  ;;  %vm285_vm13 = vmor %vm283_vm11, %vm284_vm9 }
  0xc1   : > { %v279_v16 = vmul.f32 %v668_v3, %v278_v10  ;;  %v370_v17 = vmul.f32 %v369_v9, %v368_v15  ;;  %v424_v18 = vsel %vm423_vm7, %v664_v57, %v420_v11 }
  0xc2   : > { %v252_v19 = vmul.f32 0.5, %v251_v14  ;;  %v426_v20 = vmul.f32 %v425_v13, %v424_v18 }
  0xc3   : > { %v280_v21 = vmul.f32 0.5, %v279_v16  ;;  %579 = vmatmul.msk.f32.vlgmr.msra.gmra.mxu2 %vm235_vm0, %v370_v17 }
  0xc4   : > { %v253_v22 = vsub.f32 1.5, %v252_v19  ;;  %583 = vmatmul.msk.f32.vlgmr.msra.gmra.mxu3 %vm235_vm0, %v426_v20 }
  0xc5   : > { %v281_v5 = vsub.f32 1.5, %v280_v21 }
  0xc6   : > { %v254_v4 = vmul.f32 %v666_v1, %v253_v22 }
  0xc7   : > { %v282_v24 = vmul.f32 %v668_v3, %v281_v5 }
  0xc8   : > { %v258_v26 = vsel %vm257_vm12, %v666_v1, %v254_v4 }
  0xc9   : > { %v286_v27 = vsel %vm285_vm13, %v668_v3, %v282_v24  ;;  %v260_v28 = vmul.f32 %v259_v23, %v258_v26 }
  0xca   : > { %v288_v29 = vmul.f32 %v287_v25, %v286_v27 }
  0xcb   : > { %575 = vmatmul.msk.f32.vlgmr.msra.gmra.mxu1 %vm235_vm0, %v260_v28 }
  0xcc   : > { %573 = vmatmul.msk.f32.vlgmr.msra.gmra.mxu0 %vm235_vm0, %v288_v29 }
 0x146   : > { %v396_v6 = vpop.f32.mrf.mxu2 }
 0x147   : > { %v452_v34 = vpop.f32.mrf.mxu3 }
 0x148   : > { %v341_v12 = vpop.f32.mrf.mxu1 }
 0x149   : > { %v315_v30 = vpop.f32.mrf.mxu0 }
 0x14a   : > { %v342_v31 = vadd.f32 %v341_v12, %v315_v30 }
 0x14c   : > { %v399_v32 = vadd.f32 %v396_v6, %v342_v31 }
 0x14e   : > { %v455_v35 = vadd.f32 %v452_v34, %v399_v32 }
 0x150   : > { %v460_v36 = vadd.f32 %v660_v33, %v455_v35 }
 0x152   : > { %461 = vst [vmem:[%s233_s16] sm:$0xff] %v460_v36 }
 0x153   : > { %696 = shalt.err (!%p693_p7)
}
 0x154   : > { %589 = dma.vmem_to_hbm [thread:$0]  (%p845_p8), %s478_s15, 128, %s480_s7, %s463_s8  }
 0x155 PF: > { %p595_p10 = scmp.ge.s32.totalorder %s763_s19, 2  ;;  %s491_s24 = sand.u32 1, %s735_s12  }
 0x156   : > { %s492_s29 = scalar_lea.sflag [#allocation4], %s491_s24 }
 0x157   : > { %p592_p11 = pnand %p595_p10, %p849_p9 }
 0x159   : > { %p593_p12 = pneg %p592_p11 }
 0x15b   : > { %730 = dma.done.wait (%p593_p12), %s492_s29, 128  }
 0x15c   : > { %732 = vsyncadd (%p593_p12), %s492_s29, 4294967168  ;;  %s16_s19 = sadd.s32 1, %s763_s19   ;;  %s997_s12 = smov %s739_s13 }
 0x15d   : > { %p13_p13 = scmp.ge.s32.totalorder %s16_s19, 18   ;;  %s998_s13 = smov %s743_s14 }
 0x15e   : > { %s999_s14 = smov %s857_s4  ;;  %s1000_s15 = smov %s755_s17 }
 0x15f   : > { %s1001_s16 = smov %s759_s18  ;;  %s1002_s17 = smov %s1005_s22 }
 0x160   : > { %s1003_s18 = smov %s1009_s23  ;;  %15 = sbr.rel (!%p13_p13) target bundleno = 5 (0x5), region = 116 }
 0x165   :  { %498 = vsyncpa [#allocation4], 1 }
 0x166   :  { %500 = vsyncpa [#allocation4 + $0x1], 1 }

</bundles_post_ra>
